<compile_context>
chip_gen: v7x
topology: tpu7x:2x2x1
jax: 0.10.0
libtpu: 0.0.40
codegen_flags: <defaults>
</compile_context>

<pallas_src>
import functools

import numpy as np
import jax
import jax.numpy as jnp
from jax import lax
from jax.experimental import pallas as pl
from jax.experimental.pallas import tpu as pltpu


def _coordconv_kernel(x_ref, w_ref, cb_ref, o_ref, *, tm):
    """One (batch, output-row-tile) grid step.

    x_ref : (1, TM, K)         im2row input rows (K = KH*W*Cin)
    w_ref : (K, Npad)          Toeplitz-along-W weights, grid-resident
    cb_ref: (Hout_pad, Npad)   coord-conv + bias map, grid-resident, f32
    o_ref : (1, TM, Npad)      output row tile (lane-dense last dim)
    """
    r0 = pl.multiple_of(pl.program_id(1) * tm, 8)     # tm is a multiple of 8
    # Single deep-K MXU matmul (KH taps fused); f32 accumulation.
    acc = jnp.dot(x_ref[0], w_ref[...], preferred_element_type=jnp.float32)
    # Data-independent coord-channel + bias term, sliced from the resident map.
    acc = acc + cb_ref[pl.ds(r0, tm), :]
    o_ref[0] = acc.astype(o_ref.dtype)


def _round_up(x, m):
    return (x + m - 1) // m * m


def _pick_row_tile(hout_pad, k_dim, n_pad, in_itemsize, out_itemsize,
                   max_rows=None, vmem_budget=32 << 20):
    """Largest multiple-of-8 divisor of hout_pad whose pipeline footprint fits.

    Footprint accounts for the double-buffered x/out blocks plus the resident
    w_t / cb blocks (counted twice: default double buffering, conservative).
    Returns (tile_rows, footprint_bytes).
    """
    cands = [d for d in range(8, hout_pad + 1, 8) if hout_pad % d == 0]
    if max_rows is not None:
        filtered = [d for d in cands if d <= max(8, int(max_rows))]
        cands = filtered if filtered else [8]
    resident = 2 * k_dim * n_pad * in_itemsize + 2 * hout_pad * n_pad * 4

    def footprint(tm):
        return (2 * tm * k_dim * in_itemsize        # x block, double-buffered
                + 2 * tm * n_pad * out_itemsize     # out block, double-buffered
                + resident)                         # resident w_t + cb

    feas = [d for d in cands if footprint(d) <= vmem_budget]
    tm = max(feas) if feas else min(cands)          # min(cands) == 8: smallest legal tile
    return tm, footprint(tm)


@functools.partial(jax.jit,
                   static_argnames=("padding", "max_rows_per_tile",
                                    "compute_dtype"))
def coord_conv(x_nchw, weight, bias, *, padding=1, max_rows_per_tile=None,
               compute_dtype=jnp.bfloat16):
    """CoordConv forward. x_nchw: (B,C,H,W); weight: (Cout, C+2, KH, KW)."""
    B, C, H, W = x_nchw.shape
    Cout, Cin_tot, KH, KW = weight.shape
    assert Cin_tot == C + 2
    Hout = H + 2 * padding - KH + 1
    Wout = W + 2 * padding - KW + 1
    f32 = jnp.float32
    cdt = jnp.dtype(compute_dtype)
    out_dt = jnp.dtype(x_nchw.dtype)

    Nout = Wout * Cout
    Npad = _round_up(Nout, 128)          # lane-dense output / MXU N
    Hout_pad = _round_up(Hout, 8)        # (8,128)-aligned row tiles
    Kdim = KH * W * C                    # fused deep-K contraction

    # --- data-independent coord-channel contribution + bias (exact, f32) -----
    i_range = jnp.linspace(-1.0, 1.0, W, dtype=f32)            # varies along W
    j_range = jnp.linspace(-1.0, 1.0, H, dtype=f32)            # varies along H
    coords = jnp.stack([jnp.broadcast_to(i_range[None, :], (H, W)),
                        jnp.broadcast_to(j_range[:, None], (H, W))], 0)[None]
    w_coord = weight[:, C:, :, :].astype(f32)                  # (Cout, 2, KH, KW)
    cb = lax.conv_general_dilated(
        coords, w_coord, (1, 1), [(padding, padding)] * 2,
        dimension_numbers=("NCHW", "OIHW", "NCHW"))[0]         # (Cout, Hout, Wout)
    cb = cb + bias.astype(f32)[:, None, None]
    cb = jnp.transpose(cb, (1, 2, 0)).reshape(Hout, Nout)
    cb = jnp.pad(cb, ((0, Hout_pad - Hout), (0, Npad - Nout)))  # (Hout_pad, Npad)

    # --- Toeplitz-along-W weights for the real C channels, fused over KH -----
    # w_t[kh*W*C + p*C + ci, q*Cout + co] = weight[co, ci, kh, p - q + padding]
    # (zero when the tap falls outside [0, KW) -> implements W zero-padding).
    wk = jnp.transpose(weight[:, :C, :, :], (2, 3, 1, 0)).astype(f32)  # (KH,KW,C,Cout)
    p = jnp.arange(W)[:, None, None]
    q = jnp.arange(Wout)[None, :, None]
    kk = jnp.arange(KW)[None, None, :]
    delta = (p == q + kk - padding).astype(f32)                # (W, Wout, KW)
    w_t = jnp.einsum("pqk,hkio->hpiqo", delta, wk).reshape(KH, W * C, Nout)
    w_t = jnp.pad(w_t, ((0, 0), (0, 0), (0, Npad - Nout)))
    w_t = w_t.reshape(Kdim, Npad).astype(cdt)

    # --- input: NCHW -> (B, rows, W*C), H zero-pad, im2row over the KH taps ---
    # TODO(synk): keep activations NHWC upstream / window rows at large H to
    #             avoid this extra wrapper-side HBM pass and the KH-fold im2row
    #             replication.
    x_rows = jnp.transpose(x_nchw, (0, 2, 3, 1)).reshape(B, H, W * C)
    x_rows = jnp.pad(
        x_rows, ((0, 0), (padding, Hout_pad + KH - 1 - H - padding), (0, 0)))
    xim = jnp.concatenate([x_rows[:, kh:kh + Hout_pad, :] for kh in range(KH)],
                          axis=-1).astype(cdt)                 # (B, Hout_pad, Kdim)

    TM, footprint = _pick_row_tile(Hout_pad, Kdim, Npad,
                                   cdt.itemsize, out_dt.itemsize,
                                   max_rows=max_rows_per_tile)
    nT = Hout_pad // TM
    grid = (B, nT)

    kernel = functools.partial(_coordconv_kernel, tm=TM)
    flops = 2 * B * Hout_pad * Kdim * Npad
    bytes_accessed = (xim.size * cdt.itemsize + w_t.size * cdt.itemsize
                      + cb.size * 4 + B * Hout_pad * Npad * out_dt.itemsize)
    vmem_limit = int(min(128 << 20, max(32 << 20, 2 * footprint + (4 << 20))))

    out_flat = pl.pallas_call(
        kernel,
        out_shape=jax.ShapeDtypeStruct((B, Hout_pad, Npad), out_dt),
        grid=grid,
        in_specs=[
            # im2row input tile, pipelined per (batch, row-tile) step.
            pl.BlockSpec((1, TM, Kdim), lambda b, t: (b, t, 0)),
            # Toeplitz weights: constant index -> resident for the whole grid.
            pl.BlockSpec((Kdim, Npad), lambda b, t: (0, 0)),
            # Coord + bias map: resident; sliced with pl.ds inside the kernel.
            pl.BlockSpec((Hout_pad, Npad), lambda b, t: (0, 0)),
        ],
        out_specs=pl.BlockSpec((1, TM, Npad), lambda b, t: (b, t, 0)),
        compiler_params=pltpu.CompilerParams(
            dimension_semantics=("parallel", "parallel"),
            vmem_limit_bytes=vmem_limit),
        cost_estimate=pl.CostEstimate(
            flops=int(flops), transcendentals=0,
            bytes_accessed=int(bytes_accessed)),
    )(xim, w_t, cb)

    out = out_flat[:, :Hout, :Nout].reshape(B, Hout, Wout, Cout)
    return jnp.transpose(out, (0, 3, 1, 2))                    # back to NCHW


def init_params(key, in_channels, out_channels, kh, kw):
    """Deterministic xavier_uniform_ weight, zero bias (matches reset_parameters)."""
    cin_tot = in_channels + 2
    fan_in = cin_tot * kh * kw
    fan_out = out_channels * kh * kw
    bound = float(np.sqrt(6.0 / (fan_in + fan_out)))
    weight = jax.random.uniform(
        key, (out_channels, cin_tot, kh, kw), jnp.float32, -bound, bound)
    bias = jnp.zeros((out_channels,), jnp.float32)
    return weight, bias


def reference_coordconv(x_nchw, weight, bias, padding):
    """Pure-JAX reference (lax conv on the coord-augmented input)."""
    B, C, H, W = x_nchw.shape
    f32 = jnp.float32
    i_range = jnp.linspace(-1.0, 1.0, W, dtype=f32)
    j_range = jnp.linspace(-1.0, 1.0, H, dtype=f32)
    ii = jnp.broadcast_to(i_range[None, :], (H, W))
    jj = jnp.broadcast_to(j_range[:, None], (H, W))
    coords = jnp.broadcast_to(jnp.stack([ii, jj], 0)[None],
                              (B, 2, H, W)).astype(x_nchw.dtype)
    x_aug = jnp.concatenate([x_nchw, coords], axis=1)
    out = lax.conv_general_dilated(
        x_aug, weight, (1, 1), [(padding, padding)] * 2,
        dimension_numbers=("NCHW", "OIHW", "NCHW"))
    return out + bias[None, :, None, None]


if __name__ == "__main__":
    key = jax.random.PRNGKey(0)

    cases = [
        # (B, C, H,  W,  Cout, KH, KW, pad, max_rows, compute_dtype, atol)
        (2, 4, 16, 16, 8, 3, 3, 1, None, jnp.float32,  2e-4),  # exact-lowering check
        (2, 4, 16, 16, 8, 3, 3, 1, None, jnp.bfloat16, 3e-2),  # Nout=128 lane-dense
        (2, 4, 16, 16, 8, 3, 3, 1, 8,    jnp.bfloat16, 3e-2),  # force 2 row tiles
        (1, 3, 20, 20, 5, 3, 3, 0, None, jnp.bfloat16, 3e-2),  # odd sizes: Nout 90->128, Hout 18->24
    ]
    for (B, C, H, W, Cout, KH, KW, pad, max_rows, cdt, atol) in cases:
        kx, kw_key, kb_key, key = jax.random.split(key, 4)
        x = jax.random.normal(kx, (B, C, H, W), jnp.float32)
        weight, bias = init_params(kw_key, C, Cout, KH, KW)
        # Non-zero bias to exercise the bias path (module semantics unchanged).
        bias = bias + 0.1 * jax.random.normal(kb_key, (Cout,), jnp.float32)

        out = jax.block_until_ready(coord_conv(
            x, weight, bias, padding=pad, max_rows_per_tile=max_rows,
            compute_dtype=cdt))
        ref = jax.block_until_ready(reference_coordconv(x, weight, bias, pad))

        assert out.shape == ref.shape, (out.shape, ref.shape)
        np.testing.assert_allclose(np.asarray(out), np.asarray(ref),
                                   atol=atol, rtol=atol)

    print("KERNEL_OK")
</pallas_src>

<mosaic_0001>
module attributes {stable_mosaic.version = 11 : i64} {
  func.func @_coordconv_kernel(%arg0: i32, %arg1: i32, %arg2: memref<1x16x192xf32, #tpu.memory_space<vmem>>, %arg3: memref<192x128xf32, #tpu.memory_space<vmem>>, %arg4: memref<16x128xf32, #tpu.memory_space<vmem>>, %arg5: memref<1x16x128xf32, #tpu.memory_space<vmem>>) attributes {dimension_semantics = [#tpu.dimension_semantics<parallel>, #tpu.dimension_semantics<parallel>], iteration_bounds = array<i64: 2, 1>, scalar_prefetch = 0 : i64, scratch_operands = 0 : i64, tpu.core_type = #tpu.core_type<tc>, window_params = [{transform_indices = @transform_0, window_bounds = array<i64: 1, 16, 192>}, {pipeline_mode = #tpu.pipeline_mode<synchronous>, transform_indices = @transform_1, window_bounds = array<i64: 192, 128>}, {pipeline_mode = #tpu.pipeline_mode<synchronous>, transform_indices = @transform_2, window_bounds = array<i64: 16, 128>}, {transform_indices = @transform_3, window_bounds = array<i64: 1, 16, 128>}]} {
    %c16_i32 = arith.constant 16 : i32
    %0 = arith.muli %arg1, %c16_i32 : i32
    %1 = tpu.assume_multiple %0, 8 : i32
    %c0 = arith.constant 0 : index
    %c0_0 = arith.constant 0 : index
    %c0_1 = arith.constant 0 : index
    %2 = vector.load %arg2[%c0, %c0_0, %c0_1] : memref<1x16x192xf32, #tpu.memory_space<vmem>>, vector<1x16x192xf32>
    %3 = vector.shape_cast %2 : vector<1x16x192xf32> to vector<16x192xf32>
    %c0_2 = arith.constant 0 : index
    %c0_3 = arith.constant 0 : index
    %4 = vector.load %arg3[%c0_2, %c0_3] : memref<192x128xf32, #tpu.memory_space<vmem>>, vector<192x128xf32>
    %cst = arith.constant dense<0.000000e+00> : vector<16x128xf32>
    %5 = tpu.matmul %3, %4, %cst {dimension_numbers = #tpu.dot_dimension_numbers<[1], [0], [0], [1], [0, 0, 1, 1], [], []>} : vector<16x192xf32>, vector<192x128xf32>, vector<16x128xf32> -> vector<16x128xf32>
    %6 = arith.index_cast %1 : i32 to index
    %c0_4 = arith.constant 0 : index
    %7 = vector.load %arg4[%6, %c0_4] : memref<16x128xf32, #tpu.memory_space<vmem>>, vector<16x128xf32>
    %8 = arith.addf %5, %7 : vector<16x128xf32>
    %c0_5 = arith.constant 0 : index
    %c0_6 = arith.constant 0 : index
    %c0_7 = arith.constant 0 : index
    %9 = vector.load %arg5[%c0_5, %c0_6, %c0_7] : memref<1x16x128xf32, #tpu.memory_space<vmem>>, vector<1x16x128xf32>
    %10 = vector.shape_cast %9 : vector<1x16x128xf32> to vector<16x128xf32>
    %11 = vector.shape_cast %8 : vector<16x128xf32> to vector<1x16x128xf32>
    tpu.vector_store %arg5[%c0_5, %c0_6, %c0_7], %11 {strides = array<i32>} : memref<1x16x128xf32, #tpu.memory_space<vmem>>, vector<1x16x128xf32>,
    return
  }
  func.func @transform_0(%arg0: i32, %arg1: i32) -> (i32, i32, i32) {
    %c0_i32 = arith.constant 0 : i32
    %c0_i32_0 = arith.constant 0 : i32
    return %arg0, %arg1, %c0_i32 : i32, i32, i32
  }
  func.func @transform_1(%arg0: i32, %arg1: i32) -> (i32, i32) {
    %c0_i32 = arith.constant 0 : i32
    %c0_i32_0 = arith.constant 0 : i32
    %c0_i32_1 = arith.constant 0 : i32
    return %c0_i32, %c0_i32_0 : i32, i32
  }
  func.func @transform_2(%arg0: i32, %arg1: i32) -> (i32, i32) {
    %c0_i32 = arith.constant 0 : i32
    %c0_i32_0 = arith.constant 0 : i32
    %c0_i32_1 = arith.constant 0 : i32
    return %c0_i32, %c0_i32_0 : i32, i32
  }
  func.func @transform_3(%arg0: i32, %arg1: i32) -> (i32, i32, i32) {
    %c0_i32 = arith.constant 0 : i32
    %c0_i32_0 = arith.constant 0 : i32
    return %arg0, %arg1, %c0_i32 : i32, i32, i32
  }
}

</mosaic_0001>

<bundles_post_ra>
// kernel: coord_conv.1
= control target key start
LH: loop header
LB: loop body
LE: loop exit
PB: predicated region body
PF: predicated region fallthrough
CT: control target
= control target key end

     0   :  { %s566_s12 = smov 0   ;;  %s568_s13 = smov 0   ;;  %s711_s0 = inlined_call_operand.vmem [shape: f32[2,16,192], index: 0, kind: input, shape index: {}]   ;;  %s712_s1 = inlined_call_operand.vmem [shape: f32[192,128], index: 1, kind: input, shape index: {}]   ;;  %s713_s2 = inlined_call_operand.vmem [shape: f32[16,128], index: 2, kind: input, shape index: {}]   ;;  %s714_s3 = inlined_call_operand.vmem [shape: f32[2,16,128], index: 3, kind: output, shape index: {}]  }
   0x1   :  { %s570_s14 = smov 0  }
   0x2 LB: > { %s25_s15 = sadd.s32 1, %s539_s13  ;;  %p425_p0 = scmp.ge.s32.totalorder %s543_s14, 1  ;;  %s543_s14 = sphi %s570_s14, %s13_s14   ;;  %s539_s13 = sphi %s568_s13, %s716_s13   ;;  %s535_s12 = sphi %s566_s12, %s715_s12  }
   0x3   : > { %p27_p1 = scmp.ge.s32.totalorder %s25_s15, 2  ;;  %p159_p2 = scmp.lt.s32.totalorder %s543_s14, 3 }
   0x5   : > { %s718_s15 = smov (%p27_p1, %s25_s15), 0  ;;  %p160_p3 = pnand %p425_p0, %p159_p2 }
   0x6   : > { %v218_v0 = vld [vmem:[%s712_s1] sm:$0xff] (!%p160_p3)  ;;  %v219_v1 = vld [vmem:[%s712_s1 + $0x8] sm:$0xff] (!%p160_p3)  ;;  %v220_v2 = vld [vmem:[%s712_s1 + $0x10] sm:$0xff] (!%p160_p3)  ;;  %p193_p4 = scmp.lt.s32.totalorder (!%p160_p3), %s535_s12, 1  ;;  %v545_v3 = vmov (!%p160_p3), 0.0|0.0   ;;  %vm245_vm0 = vcmask (!%p160_p3), 523264  }
   0x7   : > { %163 = sbr.rel (%p160_p3) target bundleno = 271 (0x10f), region = 32  ;;  %436 = vmatprep.subr.bf16.mxu0 (!%p160_p3), %v545_v3  ;;  %472 = vmatprep.subr.bf16.mxu1 (!%p160_p3), %v545_v3  ;;  %v437_v4 = vpack.c.bf16 (!%p160_p3), %v219_v1, %v218_v0  ;;  %v221_v5 = vld [vmem:[%s712_s1 + $0x18] sm:$0xff] (!%p160_p3)  ;;  %v222_v7 = vld [vmem:[%s712_s1 + $0x20] sm:$0xff] (!%p160_p3)  ;;  %v223_v8 = vld [vmem:[%s712_s1 + $0x28] sm:$0xff] (!%p160_p3) }
   0x8   : > { %v440_v6 = vpack.c.bf16 (!%p160_p3), %v221_v5, %v220_v2  ;;  %v443_v9 = vpack.c.bf16 (!%p160_p3), %v223_v8, %v222_v7  ;;  %v224_v10 = vld [vmem:[%s712_s1 + $0x30] sm:$0xff] (!%p160_p3)  ;;  %v225_v11 = vld [vmem:[%s712_s1 + $0x38] sm:$0xff] (!%p160_p3)  ;;  %v226_v15 = vld [vmem:[%s712_s1 + $0x40] sm:$0xff] (!%p160_p3) }
   0x9   : > { %438 = vmatpush1.bf16.msra.mxu0 (!%p160_p3), %v437_v4  ;;  %484 = vmatpush1.bf16.msra.mxu1 (!%p160_p3), %v437_v4  ;;  %v446_v14 = vpack.c.bf16 (!%p160_p3), %v225_v11, %v224_v10  ;;  %v227_v16 = vld [vmem:[%s712_s1 + $0x48] sm:$0xff] (!%p160_p3)  ;;  %v228_v18 = vld [vmem:[%s712_s1 + $0x50] sm:$0xff] (!%p160_p3)  ;;  %v229_v19 = vld [vmem:[%s712_s1 + $0x58] sm:$0xff] (!%p160_p3) }
   0xa   : > { %439 = vmatprep.subr.bf16.mxu0 (!%p160_p3), %v545_v3  ;;  %473 = vmatprep.subr.bf16.mxu1 (!%p160_p3), %v545_v3  ;;  %v449_v17 = vpack.c.bf16 (!%p160_p3), %v227_v16, %v226_v15  ;;  %v452_v20 = vpack.c.bf16 (!%p160_p3), %v229_v19, %v228_v18  ;;  %v230_v21 = vld [vmem:[%s712_s1 + $0x60] sm:$0xff] (!%p160_p3)  ;;  %v231_v22 = vld [vmem:[%s712_s1 + $0x68] sm:$0xff] (!%p160_p3)  ;;  %v232_v24 = vld [vmem:[%s712_s1 + $0x70] sm:$0xff] (!%p160_p3) }
   0xb   : > { %v455_v23 = vpack.c.bf16 (!%p160_p3), %v231_v22, %v230_v21  ;;  %v233_v25 = vld [vmem:[%s712_s1 + $0x78] sm:$0xff] (!%p160_p3)  ;;  %v234_v27 = vld [vmem:[%s712_s1 + $0x80] sm:$0xff] (!%p160_p3)  ;;  %v235_v28 = vld [vmem:[%s712_s1 + $0x88] sm:$0xff] (!%p160_p3) }
   0xc   : > { %v458_v26 = vpack.c.bf16 (!%p160_p3), %v233_v25, %v232_v24  ;;  %v461_v29 = vpack.c.bf16 (!%p160_p3), %v235_v28, %v234_v27  ;;  %v236_v30 = vld [vmem:[%s712_s1 + $0x90] sm:$0xff] (!%p160_p3)  ;;  %v237_v31 = vld [vmem:[%s712_s1 + $0x98] sm:$0xff] (!%p160_p3)  ;;  %v238_v33 = vld [vmem:[%s712_s1 + $0xa0] sm:$0xff] (!%p160_p3) }
   0xd   : > { %441 = vmatpush1.bf16.msra.mxu0 (!%p160_p3), %v440_v6  ;;  %485 = vmatpush1.bf16.msra.mxu1 (!%p160_p3), %v440_v6  ;;  %v464_v32 = vpack.c.bf16 (!%p160_p3), %v237_v31, %v236_v30  ;;  %v239_v34 = vld [vmem:[%s712_s1 + $0xa8] sm:$0xff] (!%p160_p3)  ;;  %v240_v36 = vld [vmem:[%s712_s1 + $0xb0] sm:$0xff] (!%p160_p3)  ;;  %v241_v37 = vld [vmem:[%s712_s1 + $0xb8] sm:$0xff] (!%p160_p3) }
   0xe   : > { %s720_s12 = smov (!%p193_p4, %s535_s12), 1  ;;  %442 = vmatprep.subr.bf16.mxu0 %v545_v3  ;;  %474 = vmatprep.subr.bf16.mxu1 %v545_v3  ;;  %v467_v35 = vpack.c.bf16 %v239_v34, %v238_v33  ;;  %v470_v38 = vpack.c.bf16 %v241_v37, %v240_v36  ;;  %v243_v41 = vld [vmem:[%s713_s2] sm:$0xff]  ;;  %v244_v42 = vld [vmem:[%s713_s2 + $0x8] sm:$0xff] }
   0xf   : > { %s434_s28 = sshll.u32 %s720_s12, 5  ;;  %s435_s23 = sshll.u32 %s720_s12, 4 }
  0x10   : > { %s612_s4 = scalar_lea.vmem %s711_s0, %s434_s28  ;;  %s211_s30 = scalar_lea.vmem %s714_s3, %s435_s23 }
  0x11   : > { %v215_v12 = vld [vmem:[%s612_s4 + $0x8] sm:$0xff]  ;;  %v217_v13 = vld [vmem:[%s612_s4 + $0x18] sm:$0xff]  ;;  %444 = vmatpush1.bf16.msra.mxu0 %v443_v9  ;;  %486 = vmatpush1.bf16.msra.mxu1 %v443_v9  ;;  %v214_v39 = vld [vmem:[%s612_s4] sm:$0xff] }
  0x12   : > { %430 = vmatprep.mubr.msk.f32.mxu0 %vm245_vm0, %v215_v12  ;;  %431 = vmatprep.mubr.msk.f32.mxu1 %vm245_vm0, %v217_v13  ;;  %v216_v40 = vld [vmem:[%s612_s4 + $0x10] sm:$0xff] }
  0x13   : > { %445 = vmatprep.subr.bf16.mxu0 %v545_v3  ;;  %475 = vmatprep.subr.bf16.mxu1 %v545_v3 }
  0x15   : > { %447 = vmatpush1.bf16.msra.mxu0 %v446_v14  ;;  %487 = vmatpush1.bf16.msra.mxu1 %v446_v14 }
  0x16   : > { %448 = vmatprep.subr.bf16.mxu0 %v545_v3  ;;  %476 = vmatprep.subr.bf16.mxu1 %v545_v3 }
  0x19   : > { %450 = vmatpush1.bf16.msra.mxu0 %v449_v17  ;;  %488 = vmatpush1.bf16.msra.mxu1 %v449_v17 }
  0x1a   : > { %451 = vmatprep.subr.bf16.mxu0 %v545_v3  ;;  %477 = vmatprep.subr.bf16.mxu1 %v545_v3 }
  0x1d   : > { %453 = vmatpush1.bf16.msra.mxu0 %v452_v20  ;;  %489 = vmatpush1.bf16.msra.mxu1 %v452_v20 }
  0x1e   : > { %454 = vmatprep.subr.bf16.mxu0 %v545_v3  ;;  %478 = vmatprep.subr.bf16.mxu1 %v545_v3 }
  0x21   : > { %456 = vmatpush1.bf16.msra.mxu0 %v455_v23  ;;  %490 = vmatpush1.bf16.msra.mxu1 %v455_v23 }
  0x22   : > { %457 = vmatprep.subr.bf16.mxu0 %v545_v3  ;;  %479 = vmatprep.subr.bf16.mxu1 %v545_v3 }
  0x25   : > { %459 = vmatpush1.bf16.msra.mxu0 %v458_v26  ;;  %491 = vmatpush1.bf16.msra.mxu1 %v458_v26 }
  0x26   : > { %460 = vmatprep.subr.bf16.mxu0 %v545_v3  ;;  %480 = vmatprep.subr.bf16.mxu1 %v545_v3 }
  0x29   : > { %462 = vmatpush1.bf16.msra.mxu0 %v461_v29  ;;  %492 = vmatpush1.bf16.msra.mxu1 %v461_v29 }
  0x2a   : > { %463 = vmatprep.subr.bf16.mxu0 %v545_v3  ;;  %481 = vmatprep.subr.bf16.mxu1 %v545_v3 }
  0x2d   : > { %465 = vmatpush1.bf16.msra.mxu0 %v464_v32  ;;  %493 = vmatpush1.bf16.msra.mxu1 %v464_v32 }
  0x2e   : > { %466 = vmatprep.subr.bf16.mxu0 %v545_v3  ;;  %482 = vmatprep.subr.bf16.mxu1 %v545_v3 }
  0x31   : > { %468 = vmatpush1.bf16.msra.mxu0 %v467_v35  ;;  %494 = vmatpush1.bf16.msra.mxu1 %v467_v35 }
  0x32   : > { %469 = vmatprep.subr.bf16.mxu0 %v545_v3  ;;  %483 = vmatprep.subr.bf16.mxu1 %v545_v3 }
  0x35   : > { %471 = vmatpush1.bf16.msra.mxu0 %v470_v38  ;;  %495 = vmatpush1.bf16.msra.mxu1 %v470_v38 }
  0x38   : > { %317 = vmatmul.mubr.f32.vlgmr.msra.gmra.mrb[0].mxu0 %v214_v39  ;;  %322 = vmatmul.mubr.f32.vlgmr.msra.gmra.mrb[0].mxu1 %v216_v40 }
 0x10b   : > { %v318_v43 = vpop.f32.mrb[0].mxu0  ;;  %v323_v44 = vpop.f32.mrb[0].mxu1 }
 0x10c   : > { %v319_v45 = vadd.f32 %v318_v43, %v243_v41  ;;  %v324_v46 = vadd.f32 %v323_v44, %v244_v42  ;;  %v320_v47 = vpop.f32.mrb[1].mxu0  ;;  %v325_v48 = vpop.f32.mrb[1].mxu1 }
 0x10e   : > { %327 = vst [vmem:[%s211_s30] sm:$0xff] %v319_v45  ;;  %328 = vst [vmem:[%s211_s30 + $0x8] sm:$0xff] %v324_v46 }
 0x10f PF: > { %s13_s14 = sadd.s32 1, %s543_s14   ;;  %s715_s12 = smov %s539_s13 }
 0x110   : > { %p10_p5 = scmp.ge.s32.totalorder %s13_s14, 4   ;;  %s716_s13 = smov %s718_s15 }
 0x112   :  { %12 = sbr.rel (!%p10_p5) target bundleno = 2 (0x2), region = 63 }

</bundles_post_ra>
